<compile_context>
chip_gen: v7x
topology: tpu7x:2x2x1
jax: 0.10.0
libtpu: 0.0.40
codegen_flags: <defaults>
</compile_context>

<pallas_src>
import functools

import jax
import jax.numpy as jnp
from jax.experimental import pallas as pl
from jax.experimental.pallas import tpu as pltpu

DUMMY_USER_ID = 1
DUMMY_NEWS_ID = 1

EMBED_SIZE = 50          # embedding_size in the torch module
E_PAD = 64               # padded embedding width (zero-filled)
H1 = 128                 # fc1 out
H2 = 64                  # fc2 out
H3 = 1                   # fc3 out
LANE = 128               # TPU vreg lane width


def _round_up(x, m):
    return ((x + m - 1) // m) * m


def _num_tensorcores():
    """Best-effort TensorCore count per chip (targets of 'parallel' grid sharding)."""
    try:
        kind = jax.devices()[0].device_kind.lower()
    except Exception:
        return 1
    if "v7" in kind or "v4" in kind or "v5p" in kind or "v5 p" in kind:
        return 2
    return 1


# --------------------------------------------------------------------------
# Kernel: one batch tile of the NCF MLP
# --------------------------------------------------------------------------
def _ncf_mlp_kernel(x_ref, w1_ref, b1_ref, w2_ref, b2_ref, w3r_ref, b3_ref,
                    out_ref):
    """x_ref:  (TB, Kx)  fused [user|news] embeddings (Kx=128) or news-only (Kx=64)
       w1_ref: (Kx, 128), b1_ref: (1, 128) f32  (may include folded user term)
       w2_ref: (128, 64), b2_ref: (1, 64) f32
       w3r_ref: (1, 64)   fc3 weight as a row (VPU path), b3_ref: (1, 1) f32
       out_ref: (1, TB)   batch on the lane axis (lane-dense store)
    """
    f32 = jnp.float32
    wdt = w2_ref.dtype          # storage dtype of the weights (f32 or bf16)

    x = x_ref[...]

    # fc1: single MXU dot (K = Kx), f32 accumulation, f32 bias + ReLU.
    # NOTE: for f32 storage the dot stays f32 (multi-pass MXU) so the result
    # is bit-comparable to the reference; bf16 storage is the perf path.
    h1 = jnp.dot(x, w1_ref[...], preferred_element_type=f32) + b1_ref[...]
    h1 = jnp.maximum(h1, 0.0)

    # fc2 (cast activations to the weight dtype only at the MXU input)
    h2 = jnp.dot(h1.astype(wdt), w2_ref[...], preferred_element_type=f32) + b2_ref[...]
    h2 = jnp.maximum(h2, 0.0)

    # fc3 off the MXU: VPU broadcast-multiply by the w3 row + XLU lane reduce.
    logit = jnp.sum(h2 * w3r_ref[...].astype(f32), axis=-1, keepdims=True) + b3_ref[...]

    # Lane-dense store: batch on the lane axis of the (1, TB) block.
    out_ref[...] = jax.nn.sigmoid(logit).reshape(1, -1).astype(out_ref.dtype)


# --------------------------------------------------------------------------
# Wrapper: tiling, padding, pallas_call
# --------------------------------------------------------------------------
def ncf_mlp_pallas(x, w1, b1, w2, b2, w3r, b3, *, tb=4096):
    """Run the NCF MLP via pallas_call, tiled over the batch dimension.

    x: (B, Kx) fused embedding block (Kx = 2*E_PAD, or E_PAD for the
       expand_as path where the user term is folded into b1).
    """
    B, Kx = x.shape
    itemsize = jnp.dtype(x.dtype).itemsize
    num_cores = _num_tensorcores()

    # --- tile selection -------------------------------------------------------
    # Lane-aligned tiles; split a single-tile batch only when there is more
    # than one TensorCore to feed, and give multi-core chips >= 2*cores steps
    # so each core's double-buffered pipeline can overlap DMA with compute.
    n_tiles_cap = pl.cdiv(B, LANE)
    if B <= tb:
        desired = 1 if num_cores == 1 else min(2 * num_cores, n_tiles_cap)
    else:
        desired = max(pl.cdiv(B, tb), 2 * num_cores if num_cores > 1 else 1)
        desired = min(desired, n_tiles_cap)
    tb_eff = _round_up(pl.cdiv(B, desired), LANE)
    grid_n = pl.cdiv(B, tb_eff)
    B_pad = grid_n * tb_eff

    if B_pad != B:
        x = jnp.pad(x, ((0, B_pad - B), (0, 0)))

    # --- specs ----------------------------------------------------------------
    x_spec = pl.BlockSpec((tb_eff, Kx), lambda i: (i, 0))
    full = lambda a: pl.BlockSpec(a.shape, lambda i: (0, 0))   # resident weights

    # --- cost estimate (advisory) ----------------------------------------------
    weight_bytes = sum(int(a.size) * jnp.dtype(a.dtype).itemsize
                       for a in (w1, b1, w2, b2, w3r, b3))
    flops = 2 * B_pad * (Kx * H1 + H1 * H2 + H2)
    bytes_accessed = int(B_pad * Kx * itemsize + weight_bytes + B_pad * 4)
    cost = pl.CostEstimate(flops=int(flops), transcendentals=int(B_pad),
                           bytes_accessed=bytes_accessed)

    # --- VMEM limit: large tiles need more than v5e's 16 MiB default scope -----
    vmem_est = int(2 * tb_eff * Kx * itemsize          # x, double-buffered
                   + 2 * tb_eff * 4                    # out, double-buffered
                   + 2 * weight_bytes                  # resident weights
                   + tb_eff * (H1 + 2 * H2 + 8) * 4)   # f32 intermediates (rough)
    vmem_limit = int(min(max(32 * 1024 * 1024, 2 * vmem_est), 56 * 1024 * 1024))

    out = pl.pallas_call(
        _ncf_mlp_kernel,
        out_shape=jax.ShapeDtypeStruct((1, B_pad), jnp.float32),
        grid_spec=pltpu.PrefetchScalarGridSpec(
            num_scalar_prefetch=0,
            grid=(grid_n,),
            in_specs=[
                x_spec,
                full(w1), full(b1),
                full(w2), full(b2),
                full(w3r), full(b3),
            ],
            out_specs=pl.BlockSpec((1, tb_eff), lambda i: (0, i)),
        ),
        compiler_params=pltpu.CompilerParams(
            dimension_semantics=("parallel",),
            vmem_limit_bytes=vmem_limit),
        cost_estimate=cost,
    )(x, w1, b1, w2, b2, w3r, b3)

    # (1, B_pad) lane-dense slab -> (B, 1), dropping batch padding.
    return out[0, :B].reshape(B, 1)


# --------------------------------------------------------------------------
# Parameter construction / preparation
# --------------------------------------------------------------------------
def init_ncf_params(key, num_users, num_news, embedding_size=EMBED_SIZE):
    """Deterministic synthetic parameters matching the torch module shapes."""
    ks = jax.random.split(key, 8)
    user_table = jax.random.normal(ks[0], (num_users + 1, embedding_size), jnp.float32)
    news_table = jax.random.normal(ks[1], (num_news + 1, embedding_size), jnp.float32)

    def linear(kw, kb, fan_in, fan_out):
        # torch.nn.Linear default init: U(-1/sqrt(fan_in), 1/sqrt(fan_in))
        bound = 1.0 / jnp.sqrt(fan_in)
        w = jax.random.uniform(kw, (fan_in, fan_out), jnp.float32, -bound, bound)
        b = jax.random.uniform(kb, (fan_out,), jnp.float32, -bound, bound)
        return w, b

    w1, b1 = linear(ks[2], ks[3], 2 * embedding_size, H1)
    w2, b2 = linear(ks[4], ks[5], H1, H2)
    w3, b3 = linear(ks[6], ks[7], H2, H3)
    return user_table, news_table, (w1, b1, w2, b2, w3, b3)


def prepare_pallas_params(user_table, news_table, params, *,
                          dtype=jnp.bfloat16, e_pad=E_PAD):
    """Zero-pad E -> e_pad, build the fused W1, reshape biases, cast weights.

    bf16 storage (default) halves embedding HBM traffic and keeps the MXU in
    single-pass mode on every generation; all accumulation / bias / ReLU /
    sigmoid stay f32.  Pass dtype=jnp.float32 for a bit-exact path.
    """
    E = user_table.shape[1]
    assert e_pad >= E and e_pad % 8 == 0
    w1, b1, w2, b2, w3, b3 = params

    pad_cols = lambda a: jnp.pad(a, ((0, 0), (0, e_pad - a.shape[1])))
    pad_rows = lambda a: jnp.pad(a, ((0, e_pad - a.shape[0]), (0, 0)))

    user_table_p = pad_cols(user_table).astype(dtype)
    news_table_p = pad_cols(news_table).astype(dtype)

    # Fused fc1 weight [in, out]: rows [0:e_pad) hit the padded user embedding,
    # rows [e_pad:2*e_pad) the padded news embedding.  Zero pad is exact.
    w1u = pad_rows(w1[:E, :])
    w1n = pad_rows(w1[E:, :])
    w1_full = jnp.concatenate([w1u, w1n], axis=0).astype(dtype)     # (2*e_pad, 128)

    pallas_params = dict(
        w1=w1_full,
        b1=b1.reshape(1, -1).astype(jnp.float32),     # biases stay f32
        w2=w2.astype(dtype),
        b2=b2.reshape(1, -1).astype(jnp.float32),
        w3r=w3.reshape(1, -1).astype(dtype),          # (1, 64) row for VPU fc3
        b3=b3.reshape(1, -1).astype(jnp.float32),
    )
    return user_table_p, news_table_p, pallas_params


# --------------------------------------------------------------------------
# Full forward: clamp ids -> gather (+concat) -> Pallas MLP
# --------------------------------------------------------------------------
@functools.partial(jax.jit, static_argnames=("tb",))
def ncf_forward(user_ids, news_ids, user_table_p, news_table_p, pparams, *, tb=4096):
    num_user_emb = user_table_p.shape[0]
    num_news_emb = news_table_p.shape[0]
    e_pad = user_table_p.shape[1]

    # torch.where(id >= num_embeddings, DUMMY_ID, id)
    user_ids = jnp.where(user_ids >= num_user_emb, DUMMY_USER_ID, user_ids)
    news_ids = jnp.where(news_ids >= num_news_emb, DUMMY_NEWS_ID, news_ids)

    ue = jnp.take(user_table_p, user_ids, axis=0)    # (Bu, e_pad)
    ne = jnp.take(news_table_p, news_ids, axis=0)    # (B,  e_pad)

    w1, b1 = pparams["w1"], pparams["b1"]
    Bu, B = ue.shape[0], ne.shape[0]

    if Bu == 1 and B != 1:
        # torch expand_as path: the user contribution is constant across the
        # batch -> fold ue @ W1_user into the fc1 bias once, outside the kernel.
        b1_eff = jnp.dot(ue.astype(jnp.float32), w1[:e_pad].astype(jnp.float32),
                         precision=jax.lax.Precision.HIGHEST) + b1      # (1, 128)
        x = ne                                        # (B, e_pad)
        w1_eff = w1[e_pad:]                           # news half (e_pad, 128)
    else:
        # Bu == B: one lane-dense fused (B, 128) input block -> single K=128 dot.
        x = jnp.concatenate([ue, ne], axis=-1)        # (B, 2*e_pad)
        w1_eff = w1
        b1_eff = b1

    return ncf_mlp_pallas(x, w1_eff, b1_eff, pparams["w2"], pparams["b2"],
                          pparams["w3r"], pparams["b3"], tb=tb)


def _reference_forward(user_ids, news_ids, user_table, news_table, params):
    """Pure-JAX reference (unpadded f32) for correctness checking."""
    w1, b1, w2, b2, w3, b3 = params
    user_ids = jnp.where(user_ids >= user_table.shape[0], DUMMY_USER_ID, user_ids)
    news_ids = jnp.where(news_ids >= news_table.shape[0], DUMMY_NEWS_ID, news_ids)
    ue = jnp.take(user_table, user_ids, axis=0)
    ne = jnp.take(news_table, news_ids, axis=0)
    ue = jnp.broadcast_to(ue, ne.shape)
    x = jnp.concatenate([ue, ne], axis=-1)
    x = jnp.maximum(x @ w1 + b1, 0.0)
    x = jnp.maximum(x @ w2 + b2, 0.0)
    return jax.nn.sigmoid(x @ w3 + b3)


# TODO(synk): MongoDB save/load, logging and the Adam training loop in the
# torch module are host-side / training concerns with no Pallas equivalent;
# only the forward pass is implemented here.

if __name__ == "__main__":
    num_users, num_news = 20, 30
    batch = 16

    key = jax.random.PRNGKey(0)
    k_param, k_uid, k_nid = jax.random.split(key, 3)

    user_table, news_table, params = init_ncf_params(k_param, num_users, num_news)

    # ids, with some deliberately out-of-range to exercise the dummy-id clamp
    user_ids = jax.random.randint(k_uid, (batch,), 0, num_users + 5, jnp.int32)
    news_ids = jax.random.randint(k_nid, (batch,), 0, num_news + 5, jnp.int32)

    ref = _reference_forward(user_ids, news_ids, user_table, news_table, params)

    # ---- exact f32 storage path (correctness) --------------------------------
    ut32, nt32, pp32 = prepare_pallas_params(user_table, news_table, params,
                                             dtype=jnp.float32)
    out32 = jax.block_until_ready(ncf_forward(user_ids, news_ids, ut32, nt32, pp32))
    assert out32.shape == (batch, 1)
    assert jnp.allclose(out32, ref, atol=1e-5, rtol=1e-5), "f32 mismatch vs reference"

    # ---- torch expand_as path (single user row, Bu == 1) ----------------------
    out1 = jax.block_until_ready(
        ncf_forward(user_ids[:1], news_ids, ut32, nt32, pp32))
    ref1 = _reference_forward(user_ids[:1], news_ids, user_table, news_table, params)
    assert jnp.allclose(out1, ref1, atol=1e-5, rtol=1e-5), "expand_as mismatch"

    # ---- bf16 storage path (perf default on all generations; f32 accum) -------
    # Intentional accuracy trade-off: tables/weights quantized at rest -> O(1e-2)
    # deviation from the f32 torch reference.
    utb, ntb, ppb = prepare_pallas_params(user_table, news_table, params,
                                          dtype=jnp.bfloat16)
    outb = jax.block_until_ready(ncf_forward(user_ids, news_ids, utb, ntb, ppb))
    assert outb.shape == (batch, 1)
    assert jnp.allclose(outb, ref, atol=5e-2, rtol=5e-2), "bf16 mismatch vs reference"

    print("KERNEL_OK")
</pallas_src>

<mosaic_0001>
module attributes {stable_mosaic.version = 11 : i64} {
  func.func @_ncf_mlp_kernel(%arg0: i32, %arg1: memref<128x128xf32, #tpu.memory_space<vmem>>, %arg2: memref<128x128xf32, #tpu.memory_space<vmem>>, %arg3: memref<1x128xf32, #tpu.memory_space<vmem>>, %arg4: memref<128x64xf32, #tpu.memory_space<vmem>>, %arg5: memref<1x64xf32, #tpu.memory_space<vmem>>, %arg6: memref<1x64xf32, #tpu.memory_space<vmem>>, %arg7: memref<1x1xf32, #tpu.memory_space<vmem>>, %arg8: memref<1x128xf32, #tpu.memory_space<vmem>>) attributes {dimension_semantics = [#tpu.dimension_semantics<parallel>], iteration_bounds = array<i64: 1>, scalar_prefetch = 0 : i64, scratch_operands = 0 : i64, tpu.core_type = #tpu.core_type<tc>, window_params = [{transform_indices = @transform_0, window_bounds = array<i64: 128, 128>}, {pipeline_mode = #tpu.pipeline_mode<synchronous>, transform_indices = @transform_1, window_bounds = array<i64: 128, 128>}, {pipeline_mode = #tpu.pipeline_mode<synchronous>, transform_indices = @transform_2, window_bounds = array<i64: 1, 128>}, {pipeline_mode = #tpu.pipeline_mode<synchronous>, transform_indices = @transform_3, window_bounds = array<i64: 128, 64>}, {pipeline_mode = #tpu.pipeline_mode<synchronous>, transform_indices = @transform_4, window_bounds = array<i64: 1, 64>}, {pipeline_mode = #tpu.pipeline_mode<synchronous>, transform_indices = @transform_5, window_bounds = array<i64: 1, 64>}, {pipeline_mode = #tpu.pipeline_mode<synchronous>, transform_indices = @transform_6, window_bounds = array<i64: 1, 1>}, {transform_indices = @transform_7, window_bounds = array<i64: 1, 128>}]} {
    %c0 = arith.constant 0 : index
    %c0_0 = arith.constant 0 : index
    %0 = vector.load %arg1[%c0, %c0_0] : memref<128x128xf32, #tpu.memory_space<vmem>>, vector<128x128xf32>
    %c0_1 = arith.constant 0 : index
    %c0_2 = arith.constant 0 : index
    %1 = vector.load %arg2[%c0_1, %c0_2] : memref<128x128xf32, #tpu.memory_space<vmem>>, vector<128x128xf32>
    %cst = arith.constant dense<0.000000e+00> : vector<128x128xf32>
    %2 = tpu.matmul %0, %1, %cst {dimension_numbers = #tpu.dot_dimension_numbers<[1], [0], [0], [1], [0, 0, 1, 1], [], []>} : vector<128x128xf32>, vector<128x128xf32>, vector<128x128xf32> -> vector<128x128xf32>
    %c0_3 = arith.constant 0 : index
    %c0_4 = arith.constant 0 : index
    %3 = vector.load %arg3[%c0_3, %c0_4] : memref<1x128xf32, #tpu.memory_space<vmem>>, vector<1x128xf32>
    %4 = vector.broadcast %3 : vector<1x128xf32> to vector<128x128xf32>
    %5 = arith.addf %2, %4 : vector<128x128xf32>
    %cst_5 = arith.constant 0.000000e+00 : f32
    %6 = vector.broadcast %cst_5 : f32 to vector<128x128xf32>
    %7 = arith.maximumf %5, %6 : vector<128x128xf32>
    %c0_6 = arith.constant 0 : index
    %c0_7 = arith.constant 0 : index
    %8 = vector.load %arg4[%c0_6, %c0_7] : memref<128x64xf32, #tpu.memory_space<vmem>>, vector<128x64xf32>
    %cst_8 = arith.constant dense<0.000000e+00> : vector<128x64xf32>
    %9 = tpu.matmul %7, %8, %cst_8 {dimension_numbers = #tpu.dot_dimension_numbers<[1], [0], [0], [1], [0, 0, 1, 1], [], []>} : vector<128x128xf32>, vector<128x64xf32>, vector<128x64xf32> -> vector<128x64xf32>
    %c0_9 = arith.constant 0 : index
    %c0_10 = arith.constant 0 : index
    %10 = vector.load %arg5[%c0_9, %c0_10] : memref<1x64xf32, #tpu.memory_space<vmem>>, vector<1x64xf32>
    %11 = vector.broadcast %10 : vector<1x64xf32> to vector<128x64xf32>
    %12 = arith.addf %9, %11 : vector<128x64xf32>
    %cst_11 = arith.constant 0.000000e+00 : f32
    %13 = vector.broadcast %cst_11 : f32 to vector<128x64xf32>
    %14 = arith.maximumf %12, %13 : vector<128x64xf32>
    %c0_12 = arith.constant 0 : index
    %c0_13 = arith.constant 0 : index
    %15 = vector.load %arg6[%c0_12, %c0_13] : memref<1x64xf32, #tpu.memory_space<vmem>>, vector<1x64xf32>
    %16 = vector.broadcast %15 : vector<1x64xf32> to vector<128x64xf32>
    %17 = arith.mulf %14, %16 : vector<128x64xf32>
    %cst_14 = arith.constant dense<0.000000e+00> : vector<128xf32>
    %18 = vector.multi_reduction <add>, %17, %cst_14 [1] : vector<128x64xf32> to vector<128xf32>
    %19 = vector.shape_cast %18 : vector<128xf32> to vector<128x1xf32>
    %c0_15 = arith.constant 0 : index
    %c0_16 = arith.constant 0 : index
    %20 = vector.load %arg7[%c0_15, %c0_16] : memref<1x1xf32, #tpu.memory_space<vmem>>, vector<1x1xf32>
    %21 = vector.broadcast %20 : vector<1x1xf32> to vector<128x1xf32>
    %22 = arith.addf %19, %21 : vector<128x1xf32>
    %23 = arith.negf %22 : vector<128x1xf32>
    %24 = math.exp %23 : vector<128x1xf32>
    %cst_17 = arith.constant 1.000000e+00 : f32
    %25 = vector.broadcast %cst_17 : f32 to vector<128x1xf32>
    %26 = arith.addf %25, %24 : vector<128x1xf32>
    %27 = arith.divf %25, %26 : vector<128x1xf32>
    %28 = vector.shape_cast %27 : vector<128x1xf32> to vector<1x128xf32>
    %c0_18 = arith.constant 0 : index
    %c0_19 = arith.constant 0 : index
    %29 = vector.load %arg8[%c0_18, %c0_19] : memref<1x128xf32, #tpu.memory_space<vmem>>, vector<1x128xf32>
    tpu.vector_store %arg8[%c0_18, %c0_19], %28 {strides = array<i32>} : memref<1x128xf32, #tpu.memory_space<vmem>>, vector<1x128xf32>,
    return
  }
  func.func @transform_0(%arg0: i32) -> (i32, i32) {
    %c0_i32 = arith.constant 0 : i32
    %c0_i32_0 = arith.constant 0 : i32
    return %arg0, %c0_i32 : i32, i32
  }
  func.func @transform_1(%arg0: i32) -> (i32, i32) {
    %c0_i32 = arith.constant 0 : i32
    %c0_i32_0 = arith.constant 0 : i32
    %c0_i32_1 = arith.constant 0 : i32
    return %c0_i32, %c0_i32_0 : i32, i32
  }
  func.func @transform_2(%arg0: i32) -> (i32, i32) {
    %c0_i32 = arith.constant 0 : i32
    %c0_i32_0 = arith.constant 0 : i32
    %c0_i32_1 = arith.constant 0 : i32
    return %c0_i32, %c0_i32_0 : i32, i32
  }
  func.func @transform_3(%arg0: i32) -> (i32, i32) {
    %c0_i32 = arith.constant 0 : i32
    %c0_i32_0 = arith.constant 0 : i32
    %c0_i32_1 = arith.constant 0 : i32
    return %c0_i32, %c0_i32_0 : i32, i32
  }
  func.func @transform_4(%arg0: i32) -> (i32, i32) {
    %c0_i32 = arith.constant 0 : i32
    %c0_i32_0 = arith.constant 0 : i32
    %c0_i32_1 = arith.constant 0 : i32
    return %c0_i32, %c0_i32_0 : i32, i32
  }
  func.func @transform_5(%arg0: i32) -> (i32, i32) {
    %c0_i32 = arith.constant 0 : i32
    %c0_i32_0 = arith.constant 0 : i32
    %c0_i32_1 = arith.constant 0 : i32
    return %c0_i32, %c0_i32_0 : i32, i32
  }
  func.func @transform_6(%arg0: i32) -> (i32, i32) {
    %c0_i32 = arith.constant 0 : i32
    %c0_i32_0 = arith.constant 0 : i32
    %c0_i32_1 = arith.constant 0 : i32
    return %c0_i32, %c0_i32_0 : i32, i32
  }
  func.func @transform_7(%arg0: i32) -> (i32, i32) {
    %c0_i32 = arith.constant 0 : i32
    %c0_i32_0 = arith.constant 0 : i32
    return %c0_i32, %arg0 : i32, i32
  }
}

</mosaic_0001>

<bundles_post_ra>
// kernel: ncf_forward.1
= control target key start
LH: loop header
LB: loop body
LE: loop exit
PB: predicated region body
PF: predicated region fallthrough
CT: control target
= control target key end

     0   :  { %vm435_vm0 = vcmask 523264   ;;  %vm678_vm1 = vcmask 130112   ;;  %vm685_vm2 = vcmask 195712   ;;  %vm692_vm3 = vcmask 261312   ;;  %s1417_s1 = inlined_call_operand.vmem [shape: f32[128,128], index: 1, kind: input, shape index: {}]   ;;  %s1418_s0 = inlined_call_operand.vmem [shape: f32[128,128], index: 0, kind: input, shape index: {}]   ;;  %s1419_s3 = inlined_call_operand.vmem [shape: f32[128,64], index: 3, kind: input, shape index: {}]   ;;  %s1420_s2 = inlined_call_operand.vmem [shape: f32[1,128], index: 2, kind: input, shape index: {}]   ;;  %s1421_s6 = inlined_call_operand.<no memory space> [shape: f32[1,1], index: 6, kind: input, shape index: {}]   ;;  %s1422_s4 = inlined_call_operand.vmem [shape: f32[1,64], index: 4, kind: input, shape index: {}]   ;;  %s1423_s5 = inlined_call_operand.vmem [shape: f32[1,64], index: 5, kind: input, shape index: {}]   ;;  %s1424_s7 = inlined_call_operand.vmem [shape: f32[1,128], index: 7, kind: output, shape index: {}]  }
   0x1   :  { %v44_v0 = vld [vmem:[%s1417_s1] sm:$0xff]  ;;  %v45_v1 = vld [vmem:[%s1417_s1 + $0x8] sm:$0xff]  ;;  %v46_v2 = vld [vmem:[%s1417_s1 + $0x10] sm:$0xff]  ;;  %vm699_vm4 = vcmask 326912   ;;  %vm706_vm5 = vcmask 392512   ;;  %vm713_vm6 = vcmask 458112  }
   0x2   :  { %v980_v3 = vpack.c.bf16 %v45_v1, %v44_v0  ;;  %v47_v4 = vld [vmem:[%s1417_s1 + $0x18] sm:$0xff]  ;;  %v48_v6 = vld [vmem:[%s1417_s1 + $0x20] sm:$0xff]  ;;  %v49_v7 = vld [vmem:[%s1417_s1 + $0x28] sm:$0xff]  ;;  %vm720_vm7 = vcmask 523712   ;;  %vm727_vm8 = vcmask 589312   ;;  %vm734_vm9 = vcmask 654912  }
   0x3   :  { %v984_v5 = vpack.c.bf16 %v47_v4, %v46_v2  ;;  %v988_v8 = vpack.c.bf16 %v49_v7, %v48_v6  ;;  %v28_v9 = vld [vmem:[%s1418_s0] sm:$0xff]  ;;  %v50_v10 = vld [vmem:[%s1417_s1 + $0x30] sm:$0xff]  ;;  %v51_v11 = vld [vmem:[%s1417_s1 + $0x38] sm:$0xff]  ;;  %vm741_vm10 = vcmask 720512   ;;  %vm748_vm11 = vcmask 786112  }
   0x4   :  { %981 = vmatprep.subr.bf16.mxu0 %v980_v3  ;;  %900 = vmatprep.mubr.f32.mxu0 %v28_v9  ;;  %v992_v12 = vpack.c.bf16 %v51_v11, %v50_v10  ;;  %v52_v13 = vld [vmem:[%s1417_s1 + $0x40] sm:$0xff]  ;;  %v53_v14 = vld [vmem:[%s1417_s1 + $0x48] sm:$0xff]  ;;  %v230_v17 = vld [vmem:[%s1419_s3 + $0x10] sm:$0xff]  ;;  %vm755_vm12 = vcmask 851712   ;;  %vm762_vm13 = vcmask 917312   ;;  %vm769_vm14 = vcmask 982912  }
   0x5   :  { %983 = vmatpush3.bf16.msra.mxu0 %v980_v3  ;;  %v228_v15 = vld [vmem:[%s1419_s3] sm:$0xff]  ;;  %v229_v16 = vld [vmem:[%s1419_s3 + $0x8] sm:$0xff]  ;;  %v231_v18 = vld [vmem:[%s1419_s3 + $0x18] sm:$0xff]  ;;  %v996_v21 = vpack.c.bf16 %v53_v14, %v52_v13  ;;  %vm776_vm15 = vcmask 1048512  }
   0x6   :  { %985 = vmatprep.subr.bf16.mxu0 %v984_v5  ;;  %v1012_v19 = vpack.c.bf16 %v229_v16, %v228_v15  ;;  %v1016_v20 = vpack.c.bf16 %v231_v18, %v230_v17  ;;  %v232_v22 = vld [vmem:[%s1419_s3 + $0x20] sm:$0xff]  ;;  %v233_v23 = vld [vmem:[%s1419_s3 + $0x28] sm:$0xff]  ;;  %v54_v24 = vld [vmem:[%s1417_s1 + $0x50] sm:$0xff] }
   0x7   :  { %v55_v25 = vld [vmem:[%s1417_s1 + $0x58] sm:$0xff]  ;;  %v1020_v26 = vpack.c.bf16 %v233_v23, %v232_v22  ;;  %v234_v28 = vld [vmem:[%s1419_s3 + $0x30] sm:$0xff]  ;;  %v56_v30 = vld [vmem:[%s1417_s1 + $0x60] sm:$0xff] }
   0x8   :  { %1013 = vmatprep.subr.bf16.mxu1 %v1012_v19  ;;  %v1000_v27 = vpack.c.bf16 %v55_v25, %v54_v24  ;;  %v235_v29 = vld [vmem:[%s1419_s3 + $0x38] sm:$0xff]  ;;  %v57_v31 = vld [vmem:[%s1417_s1 + $0x68] sm:$0xff]  ;;  %v236_v34 = vld [vmem:[%s1419_s3 + $0x40] sm:$0xff] }
   0x9   :  { %987 = vmatpush3.bf16.msra.mxu0 %v984_v5  ;;  %1015 = vmatpush3.bf16.msra.mxu1 %v1012_v19  ;;  %v1024_v32 = vpack.c.bf16 %v235_v29, %v234_v28  ;;  %v1004_v33 = vpack.c.bf16 %v57_v31, %v56_v30  ;;  %v237_v35 = vld [vmem:[%s1419_s3 + $0x48] sm:$0xff]  ;;  %v58_v36 = vld [vmem:[%s1417_s1 + $0x70] sm:$0xff]  ;;  %v59_v37 = vld [vmem:[%s1417_s1 + $0x78] sm:$0xff] }
   0xa   :  { %989 = vmatprep.subr.bf16.mxu0 %v988_v8  ;;  %1017 = vmatprep.subr.bf16.mxu1 %v1016_v20  ;;  %v1028_v38 = vpack.c.bf16 %v237_v35, %v236_v34  ;;  %v1008_v39 = vpack.c.bf16 %v59_v37, %v58_v36  ;;  %v238_v40 = vld [vmem:[%s1419_s3 + $0x50] sm:$0xff]  ;;  %v239_v41 = vld [vmem:[%s1419_s3 + $0x58] sm:$0xff]  ;;  %v240_v43 = vld [vmem:[%s1419_s3 + $0x60] sm:$0xff] }
   0xb   :  { %v1032_v42 = vpack.c.bf16 %v239_v41, %v238_v40  ;;  %v241_v44 = vld [vmem:[%s1419_s3 + $0x68] sm:$0xff]  ;;  %v30_v47 = vld [vmem:[%s1418_s0 + $0x10] sm:$0xff]  ;;  %v31_v48 = vld [vmem:[%s1418_s0 + $0x18] sm:$0xff] }
   0xc   :  { %v29_v45 = vld [vmem:[%s1418_s0 + $0x8] sm:$0xff]  ;;  %v1036_v46 = vpack.c.bf16 %v241_v44, %v240_v43  ;;  %v32_v49 = vld [vmem:[%s1418_s0 + $0x20] sm:$0xff]  ;;  %v34_v51 = vld [vmem:[%s1418_s0 + $0x30] sm:$0xff] }
   0xd   :  { %991 = vmatpush3.bf16.msra.mxu0 %v988_v8  ;;  %1019 = vmatpush3.bf16.msra.mxu1 %v1016_v20  ;;  %v33_v50 = vld [vmem:[%s1418_s0 + $0x28] sm:$0xff]  ;;  %v35_v52 = vld [vmem:[%s1418_s0 + $0x38] sm:$0xff]  ;;  %v36_v53 = vld [vmem:[%s1418_s0 + $0x40] sm:$0xff] }
   0xe   :  { %993 = vmatprep.subr.bf16.mxu0 %v992_v12  ;;  %1021 = vmatprep.subr.bf16.mxu1 %v1020_v26  ;;  %v37_v54 = vld [vmem:[%s1418_s0 + $0x48] sm:$0xff]  ;;  %v38_v55 = vld [vmem:[%s1418_s0 + $0x50] sm:$0xff]  ;;  %v39_v56 = vld [vmem:[%s1418_s0 + $0x58] sm:$0xff] }
   0xf   :  { %v40_v57 = vld [vmem:[%s1418_s0 + $0x60] sm:$0xff]  ;;  %v41_v58 = vld [vmem:[%s1418_s0 + $0x68] sm:$0xff]  ;;  %v42_v59 = vld [vmem:[%s1418_s0 + $0x70] sm:$0xff] }
  0x10   :  { %v43_v60 = vld [vmem:[%s1418_s0 + $0x78] sm:$0xff]  ;;  %v242_v61 = vld [vmem:[%s1419_s3 + $0x70] sm:$0xff]  ;;  %v784_v0 = vld [vmem:[%s1420_s2] ss:$0 sm:$0xff] }
  0x11   :  { %995 = vmatpush3.bf16.msra.mxu0 %v992_v12  ;;  %1023 = vmatpush3.bf16.msra.mxu1 %v1020_v26  ;;  %v243_v62 = vld [vmem:[%s1419_s3 + $0x78] sm:$0xff] }
  0x12   :  { %997 = vmatprep.subr.bf16.mxu0 %v996_v21  ;;  %1025 = vmatprep.subr.bf16.mxu1 %v1024_v32  ;;  %v1040_v63 = vpack.c.bf16 %v243_v62, %v242_v61 }
  0x15   :  { %999 = vmatpush3.bf16.msra.mxu0 %v996_v21  ;;  %1027 = vmatpush3.bf16.msra.mxu1 %v1024_v32 }
  0x16   :  { %1001 = vmatprep.subr.bf16.mxu0 %v1000_v27  ;;  %1029 = vmatprep.subr.bf16.mxu1 %v1028_v38 }
  0x19   :  { %1003 = vmatpush3.bf16.msra.mxu0 %v1000_v27  ;;  %1031 = vmatpush3.bf16.msra.mxu1 %v1028_v38 }
  0x1a   :  { %1005 = vmatprep.subr.bf16.mxu0 %v1004_v33  ;;  %1033 = vmatprep.subr.bf16.mxu1 %v1032_v42 }
  0x1d   :  { %1007 = vmatpush3.bf16.msra.mxu0 %v1004_v33  ;;  %1035 = vmatpush3.bf16.msra.mxu1 %v1032_v42 }
  0x1e   :  { %1009 = vmatprep.subr.bf16.mxu0 %v1008_v39  ;;  %1037 = vmatprep.subr.bf16.mxu1 %v1036_v46 }
  0x21   :  { %1011 = vmatpush3.bf16.msra.mxu0 %v1008_v39  ;;  %1039 = vmatpush3.bf16.msra.mxu1 %v1036_v46 }
  0x22   :  { %1041 = vmatprep.subr.bf16.mxu1 %v1040_v63 }
  0x24   :  { %901 = vmatmul.mubr.f32.vlgmr.msra.gmra.mrb[0].mxu0 %v29_v45 }
  0x25   :  { %903 = vmatprep.mubr.f32.mxu0 %v30_v47  ;;  %1043 = vmatpush3.bf16.msra.mxu1 %v1040_v63 }
  0x28   :  { %904 = vmatmul.mubr.f32.gmra.mrb[2].mxu0 %v31_v48 }
  0x29   :  { %906 = vmatprep.mubr.f32.mxu0 %v32_v49  ;;  %v12_v49 = vstv %s1421_s6 }
  0x2a   :  { %13 = vst [vmem:[#allocation2] sm:$0x1] %v12_v49 }
  0x2c   :  { %907 = vmatmul.mubr.f32.gmra.mrb[4].mxu0 %v33_v50  ;;  %v1305_v50 = vld [vmem:[%s1422_s4] ss:$0 sm:$0xff] }
  0x2d   :  { %909 = vmatprep.mubr.f32.mxu0 %v34_v51 }
  0x30   :  { %910 = vmatmul.mubr.f32.gmra.mrb[6].mxu0 %v35_v52 }
  0x31   :  { %912 = vmatprep.mubr.f32.mxu0 %v36_v53 }
  0x34   :  { %913 = vmatmul.mubr.f32.gmra.mrb[8].mxu0 %v37_v54 }
  0x35   :  { %915 = vmatprep.mubr.f32.mxu0 %v38_v55  ;;  %v1312_v55 = vld [vmem:[%s1423_s5] ss:$0 sm:$0xff] }
  0x38   :  { %916 = vmatmul.mubr.f32.gmra.mrb[10].mxu0 %v39_v56 }
  0x39   :  { %918 = vmatprep.mubr.f32.mxu0 %v40_v57 }
  0x3c   :  { %919 = vmatmul.mubr.f32.gmra.mrb[12].mxu0 %v41_v58 }
  0x3d   :  { %921 = vmatprep.mubr.f32.mxu0 %v42_v59 }
  0x40   :  { %922 = vmatmul.mubr.f32.gmra.mrb[14].mxu0 %v43_v60 }
  0xf7   :  { %v902_v1 = vpop.f32.mrb[0].mxu0 }
  0xf8   :  { %v139_v2 = vadd.f32 %v902_v1, %v784_v0  ;;  %v133_v3 = vpop.f32.mrb[1].mxu0 }
  0xf9   :  { %v134_v4 = vadd.f32 %v784_v0, %v133_v3 }
  0xfa   :  { %v213_v7 = vmax.f32 %v139_v2, 0.0 }
  0xfb   :  { %v905_v5 = vpop.f32.mrb[2].mxu0  ;;  %v212_v6 = vmax.f32 %v134_v4, 0.0 }
  0xfc   :  { %v149_v8 = vadd.f32 %v905_v5, %v784_v0  ;;  %v143_v9 = vpop.f32.mrb[3].mxu0 }
  0xfd   :  { %v144_v10 = vadd.f32 %v784_v0, %v143_v9  ;;  %956 = vmatprep.mubr.f32.mxu1 %v212_v6 }
  0xfe   :  { %957 = vmatmul.mubr.f32.vlgmr.msra.gmra.mrb[0].mxu1 %v213_v7  ;;  %v215_v13 = vmax.f32 %v149_v8, 0.0 }
  0xff   :  { %v214_v11 = vmax.f32 %v144_v10, 0.0  ;;  %v908_v12 = vpop.f32.mrb[4].mxu0 }
 0x100   :  { %v159_v14 = vadd.f32 %v908_v12, %v784_v0  ;;  %v153_v15 = vpop.f32.mrb[5].mxu0 }
 0x101   :  { %v154_v16 = vadd.f32 %v784_v0, %v153_v15  ;;  %959 = vmatprep.mubr.f32.mxu1 %v214_v11 }
 0x102   :  { %v217_v17 = vmax.f32 %v159_v14, 0.0  ;;  %960 = vmatmul.mubr.f32.gmra.mrb[2].mxu1 %v215_v13 }
 0x103   :  { %v216_v18 = vmax.f32 %v154_v16, 0.0  ;;  %v911_v19 = vpop.f32.mrb[6].mxu0 }
 0x104   :  { %v169_v20 = vadd.f32 %v911_v19, %v784_v0  ;;  %v163_v21 = vpop.f32.mrb[7].mxu0 }
 0x105   :  { %962 = vmatprep.mubr.f32.mxu1 %v216_v18  ;;  %v164_v22 = vadd.f32 %v784_v0, %v163_v21 }
 0x106   :  { %v219_v23 = vmax.f32 %v169_v20, 0.0  ;;  %963 = vmatmul.mubr.f32.gmra.mrb[4].mxu1 %v217_v17 }
 0x107   :  { %v218_v24 = vmax.f32 %v164_v22, 0.0  ;;  %v914_v25 = vpop.f32.mrb[8].mxu0 }
 0x108   :  { %v179_v26 = vadd.f32 %v914_v25, %v784_v0  ;;  %v173_v27 = vpop.f32.mrb[9].mxu0 }
 0x109   :  { %v174_v28 = vadd.f32 %v784_v0, %v173_v27  ;;  %965 = vmatprep.mubr.f32.mxu1 %v218_v24 }
 0x10a   :  { %v221_v29 = vmax.f32 %v179_v26, 0.0  ;;  %966 = vmatmul.mubr.f32.gmra.mrb[6].mxu1 %v219_v23 }
 0x10b   :  { %v220_v30 = vmax.f32 %v174_v28, 0.0  ;;  %v917_v31 = vpop.f32.mrb[10].mxu0 }
 0x10c   :  { %v189_v32 = vadd.f32 %v917_v31, %v784_v0  ;;  %v183_v33 = vpop.f32.mrb[11].mxu0 }
 0x10d   :  { %v184_v34 = vadd.f32 %v784_v0, %v183_v33  ;;  %968 = vmatprep.mubr.f32.mxu1 %v220_v30 }
 0x10e   :  { %v223_v35 = vmax.f32 %v189_v32, 0.0  ;;  %969 = vmatmul.mubr.f32.gmra.mrb[8].mxu1 %v221_v29 }
 0x10f   :  { %v222_v36 = vmax.f32 %v184_v34, 0.0  ;;  %v920_v37 = vpop.f32.mrb[12].mxu0 }
 0x110   :  { %v199_v38 = vadd.f32 %v920_v37, %v784_v0  ;;  %v193_v39 = vpop.f32.mrb[13].mxu0 }
 0x111   :  { %v194_v40 = vadd.f32 %v784_v0, %v193_v39  ;;  %971 = vmatprep.mubr.f32.mxu1 %v222_v36 }
 0x112   :  { %v225_v41 = vmax.f32 %v199_v38, 0.0  ;;  %972 = vmatmul.mubr.f32.gmra.mrb[10].mxu1 %v223_v35 }
 0x113   :  { %v224_v42 = vmax.f32 %v194_v40, 0.0  ;;  %v923_v43 = vpop.f32.mrb[14].mxu0 }
 0x114   :  { %v209_v44 = vadd.f32 %v923_v43, %v784_v0  ;;  %v203_v45 = vpop.f32.mrb[15].mxu0 }
 0x115   :  { %v204_v46 = vadd.f32 %v784_v0, %v203_v45  ;;  %974 = vmatprep.mubr.f32.mxu1 %v224_v42 }
 0x116   :  { %v227_v47 = vmax.f32 %v209_v44, 0.0  ;;  %975 = vmatmul.mubr.f32.gmra.mrb[12].mxu1 %v225_v41 }
 0x117   :  { %v226_v48 = vmax.f32 %v204_v46, 0.0 }
 0x119   :  { %977 = vmatprep.mubr.f32.mxu1 %v226_v48 }
 0x11a   :  { %978 = vmatmul.mubr.f32.gmra.mrb[14].mxu1 %v227_v47 }
 0x1d1   :  { %v958_v51 = vpop.f32.mrb[0].mxu1 }
 0x1d2   :  { %v323_v52 = vadd.f32 %v958_v51, %v1305_v50  ;;  %v317_v53 = vpop.f32.mrb[1].mxu1 }
 0x1d3   :  { %v318_v54 = vadd.f32 %v1305_v50, %v317_v53 }
 0x1d4   :  { %v397_v56 = vmax.f32 %v323_v52, 0.0 }
 0x1d5   :  { %v396_v57 = vmax.f32 %v318_v54, 0.0  ;;  %v961_v58 = vpop.f32.mrb[2].mxu1 }
 0x1d6   :  { %v333_v59 = vadd.f32 %v961_v58, %v1305_v50  ;;  %v327_v60 = vpop.f32.mrb[3].mxu1  ;;  %v420_v61 = vmul.f32 %v1312_v55, %v397_v56 }
 0x1d7   :  { %v328_v62 = vadd.f32 %v1305_v50, %v327_v60  ;;  %v419_v1 = vmul.f32 %v1312_v55, %v396_v57 }
 0x1d8   :  { %v399_v63 = vmax.f32 %v333_v59, 0.0  ;;  %v439_v0 = vsel %vm435_vm0, %v420_v61, 0.0 }
 0x1d9   :  { %v398_v2 = vmax.f32 %v328_v62, 0.0  ;;  %440 = vadd.xlane.f32.xlu0 %v439_v0  ;;  %v964_v3 = vpop.f32.mrb[4].mxu1  ;;  %v436_v10 = vsel %vm435_vm0, %v419_v1, 0.0 }
 0x1da   :  { %v343_v4 = vadd.f32 %v964_v3, %v1305_v50  ;;  %v337_v5 = vpop.f32.mrb[5].mxu1  ;;  %v422_v6 = vmul.f32 %v1312_v55, %v399_v63 }
 0x1db   :  { %v338_v7 = vadd.f32 %v1305_v50, %v337_v5  ;;  %v421_v11 = vmul.f32 %v1312_v55, %v398_v2 }
 0x1dc   :  { %v401_v8 = vmax.f32 %v343_v4, 0.0  ;;  %v445_v9 = vsel %vm435_vm0, %v422_v6, 0.0  ;;  %v1360_v6 = vld [vmem:[#allocation2] ss:$0 sm:$0xff] }
 0x1dd   :  { %v400_v12 = vmax.f32 %v338_v7, 0.0  ;;  %446 = vadd.xlane.f32.xlu1 %v445_v9  ;;  %437 = vadd.xlane.f32.xlu0 %v436_v10  ;;  %v967_v13 = vpop.f32.mrb[6].mxu1  ;;  %v442_v19 = vsel %vm435_vm0, %v421_v11, 0.0 }
 0x1de   :  { %v353_v14 = vadd.f32 %v967_v13, %v1305_v50  ;;  %v347_v15 = vpop.f32.mrb[7].mxu1  ;;  %v424_v20 = vmul.f32 %v1312_v55, %v401_v8 }
 0x1df   :  { %v348_v16 = vadd.f32 %v1305_v50, %v347_v15  ;;  %v423_v17 = vmul.f32 %v1312_v55, %v400_v12 }
 0x1e0   :  { %v403_v18 = vmax.f32 %v353_v14, 0.0  ;;  %v451_v30 = vsel %vm435_vm0, %v424_v20, 0.0 }
 0x1e1   :  { %443 = vadd.xlane.f32.xlu1 %v442_v19  ;;  %v402_v21 = vmax.f32 %v348_v16, 0.0  ;;  %v448_v22 = vsel %vm435_vm0, %v423_v17, 0.0  ;;  %v970_v23 = vpop.f32.mrb[8].mxu1 }
 0x1e2   :  { %449 = vadd.xlane.f32.xlu0 %v448_v22  ;;  %v363_v24 = vadd.f32 %v970_v23, %v1305_v50  ;;  %v357_v25 = vpop.f32.mrb[9].mxu1  ;;  %v426_v26 = vmul.f32 %v1312_v55, %v403_v18 }
 0x1e3   :  { %v358_v27 = vadd.f32 %v1305_v50, %v357_v25  ;;  %v425_v28 = vmul.f32 %v1312_v55, %v402_v21 }
 0x1e4   :  { %v405_v29 = vmax.f32 %v363_v24, 0.0  ;;  %v457_v35 = vsel %vm435_vm0, %v426_v26, 0.0 }
 0x1e5   :  { %452 = vadd.xlane.f32.xlu1 %v451_v30  ;;  %v404_v31 = vmax.f32 %v358_v27, 0.0  ;;  %v973_v32 = vpop.f32.mrb[10].mxu1  ;;  %v454_v33 = vsel %vm435_vm0, %v425_v28, 0.0 }
 0x1e6   :  { %v373_v34 = vadd.f32 %v973_v32, %v1305_v50  ;;  %455 = vadd.xlane.f32.xlu0 %v454_v33  ;;  %v367_v36 = vpop.f32.mrb[11].mxu1  ;;  %v428_v37 = vmul.f32 %v1312_v55, %v405_v29 }
 0x1e7   :  { %v368_v38 = vadd.f32 %v1305_v50, %v367_v36  ;;  %v427_v39 = vmul.f32 %v1312_v55, %v404_v31 }
 0x1e8   :  { %v407_v40 = vmax.f32 %v373_v34, 0.0  ;;  %v463_v45 = vsel %vm435_vm0, %v428_v37, 0.0 }
 0x1e9   :  { %458 = vadd.xlane.f32.xlu1 %v457_v35  ;;  %v406_v41 = vmax.f32 %v368_v38, 0.0  ;;  %v976_v42 = vpop.f32.mrb[12].mxu1  ;;  %v460_v43 = vsel %vm435_vm0, %v427_v39, 0.0 }
 0x1ea   :  { %v383_v44 = vadd.f32 %v976_v42, %v1305_v50  ;;  %v377_v46 = vpop.f32.mrb[13].mxu1  ;;  %v430_v47 = vmul.f32 %v1312_v55, %v407_v40  ;;  %461 = vadd.xlane.f32.xlu0 %v460_v43 }
 0x1eb   :  { %v378_v48 = vadd.f32 %v1305_v50, %v377_v46  ;;  %v429_v49 = vmul.f32 %v1312_v55, %v406_v41 }
 0x1ec   :  { %v409_v51 = vmax.f32 %v383_v44, 0.0  ;;  %v469_v57 = vsel %vm435_vm0, %v430_v47, 0.0 }
 0x1ed   :  { %464 = vadd.xlane.f32.xlu1 %v463_v45  ;;  %v408_v52 = vmax.f32 %v378_v48, 0.0  ;;  %v979_v53 = vpop.f32.mrb[14].mxu1  ;;  %v466_v54 = vsel %vm435_vm0, %v429_v49, 0.0 }
 0x1ee   :  { %v393_v56 = vadd.f32 %v979_v53, %v1305_v50  ;;  %v432_v58 = vmul.f32 %v1312_v55, %v409_v51  ;;  %v387_v59 = vpop.f32.mrb[15].mxu1  ;;  %467 = vadd.xlane.f32.xlu0 %v466_v54 }
 0x1ef   :  { %v388_v60 = vadd.f32 %v1305_v50, %v387_v59  ;;  %v431_v61 = vmul.f32 %v1312_v55, %v408_v52  ;;  %v1111_v50 = vmov 0  }
 0x1f0   :  { %v411_v62 = vmax.f32 %v393_v56, 0.0  ;;  %v475_v1 = vsel %vm435_vm0, %v432_v58, 0.0  ;;  %1045 = vset.pattern.permute.xlu1 %v1111_v50  ;;  %1046 = vset.pattern.permute.xlu0 %v1111_v50 }
 0x1f1   :  { %470 = vadd.xlane.f32.xlu1 %v469_v57  ;;  %v410_v63 = vmax.f32 %v388_v60, 0.0  ;;  %v472_v0 = vsel %vm435_vm0, %v431_v61, 0.0 }
 0x1f2   :  { %v434_v2 = vmul.f32 %v1312_v55, %v411_v62  ;;  %473 = vadd.xlane.f32.xlu0 %v472_v0 }
 0x1f3   :  { %v433_v3 = vmul.f32 %v1312_v55, %v410_v63 }
 0x1f4   :  { %v481_v5 = vsel %vm435_vm0, %v434_v2, 0.0 }
 0x1f5   :  { %476 = vadd.xlane.f32.xlu1 %v475_v1  ;;  %v478_v4 = vsel %vm435_vm0, %v433_v3, 0.0 }
 0x1f6   :  { %479 = vadd.xlane.f32.xlu0 %v478_v4 }
 0x1f9   :  { %482 = vadd.xlane.f32.xlu1 %v481_v5 }
 0x266   :  { %v441_v7 = vpop.xlane.xlu0 %440 }
 0x267   :  { %v492_v8 = vadd.f32 %v1360_v6, %v441_v7 }
 0x269   :  { %v789_v9 = vmul.f32 -1.442695, %v492_v8 }
 0x26a   :  { %v447_v10 = vpop.xlane.xlu1 %446  ;;  %v438_v11 = vpop.xlane.xlu0 %437 }
 0x26b   :  { %1047 = vpow2.f32 %v789_v9  ;;  %v494_v55 = vadd.f32 %v1360_v6, %v447_v10  ;;  %v491_v12 = vadd.f32 %v1360_v6, %v438_v11 }
 0x26d   :  { %v791_v13 = vmul.f32 -1.442695, %v494_v55  ;;  %v788_v14 = vmul.f32 -1.442695, %v491_v12 }
 0x26e   :  { %v444_v15 = vpop.xlane.xlu1 %443 }
 0x26f   :  { %1049 = vpow2.f32 %v791_v13  ;;  %v493_v16 = vadd.f32 %v1360_v6, %v444_v15  ;;  %v450_v17 = vpop.xlane.xlu0 %449 }
 0x270   :  { %1051 = vpow2.f32 %v788_v14  ;;  %v495_v18 = vadd.f32 %v1360_v6, %v450_v17 }
 0x271   :  { %v790_v19 = vmul.f32 -1.442695, %v493_v16 }
 0x272   :  { %v792_v20 = vmul.f32 -1.442695, %v495_v18  ;;  %v453_v21 = vpop.xlane.xlu1 %452 }
 0x273   :  { %1053 = vpow2.f32 %v790_v19  ;;  %v496_v22 = vadd.f32 %v1360_v6, %v453_v21  ;;  %v456_v23 = vpop.xlane.xlu0 %455 }
 0x274   :  { %v497_v24 = vadd.f32 %v1360_v6, %v456_v23  ;;  %1055 = vpow2.f32 %v792_v20 }
 0x275   :  { %v1048_v25 = vpop.eup %1047  ;;  %v793_v26 = vmul.f32 -1.442695, %v496_v22 }
 0x276   :  { %v556_v27 = vadd.f32 1.0, %v1048_v25  ;;  %v459_v28 = vpop.xlane.xlu1 %458  ;;  %v794_v29 = vmul.f32 -1.442695, %v497_v24 }
 0x277   :  { %1057 = vpow2.f32 %v793_v26  ;;  %v498_v30 = vadd.f32 %v1360_v6, %v459_v28  ;;  %v462_v31 = vpop.xlane.xlu0 %461 }
 0x278   :  { %1059 = vrcp.f32 %v556_v27  ;;  %v499_v37 = vadd.f32 %v1360_v6, %v462_v31 }
 0x279   :  { %v1050_v32 = vpop.eup %1049  ;;  %v795_v33 = vmul.f32 -1.442695, %v498_v30  ;;  %1061 = vpow2.f32 %v794_v29 }
 0x27a   :  { %v1052_v34 = vpop.eup %1051  ;;  %v558_v35 = vadd.f32 1.0, %v1050_v32  ;;  %v465_v36 = vpop.xlane.xlu1 %464  ;;  %v796_v45 = vmul.f32 -1.442695, %v499_v37 }
 0x27b   :  { %v555_v38 = vadd.f32 1.0, %v1052_v34  ;;  %1063 = vpow2.f32 %v795_v33  ;;  %v500_v39 = vadd.f32 %v1360_v6, %v465_v36  ;;  %v468_v40 = vpop.xlane.xlu0 %467 }
 0x27c   :  { %1065 = vrcp.f32 %v558_v35  ;;  %v501_v46 = vadd.f32 %v1360_v6, %v468_v40 }
 0x27d   :  { %v1054_v41 = vpop.eup %1053  ;;  %1067 = vrcp.f32 %v555_v38  ;;  %v797_v42 = vmul.f32 -1.442695, %v500_v39  ;;  %v667_v38 = vlaneseq }
 0x27e   :  { %v557_v43 = vadd.f32 1.0, %v1054_v41  ;;  %v471_v44 = vpop.xlane.xlu1 %470  ;;  %v1056_v49 = vpop.eup %1055  ;;  %v798_v57 = vmul.f32 -1.442695, %v501_v46 }
 0x27f   :  { %1069 = vpow2.f32 %v797_v42  ;;  %v502_v47 = vadd.f32 %v1360_v6, %v471_v44  ;;  %v474_v48 = vpop.xlane.xlu0 %473  ;;  %v559_v61 = vadd.f32 1.0, %v1056_v49  ;;  %v1378_v40 = vand.u32 127, %v667_v38 }
 0x280   :  { %1071 = vrcp.f32 %v557_v43  ;;  %v503_v58 = vadd.f32 %v1360_v6, %v474_v48  ;;  %v1381_v43 = vshrl.u32 %v667_v38, 7 }
 0x281   :  { %v1058_v51 = vpop.eup %1057  ;;  %v799_v52 = vmul.f32 -1.442695, %v502_v47  ;;  %1073 = vpow2.f32 %v796_v45  ;;  %v680_v42 = vadd.s32 4294967280, %v1378_v40  ;;  %v673_v44 = vadd.s32 4294967288, %v1378_v40 }
 0x282   :  { %v1060_v53 = vpop.eup %1059  ;;  %v560_v54 = vadd.f32 1.0, %v1058_v51  ;;  %v477_v56 = vpop.xlane.xlu1 %476  ;;  %v800_v3 = vmul.f32 -1.442695, %v503_v58  ;;  %v671_v46 = vsub.s32 %v1378_v40, %v1381_v43  ;;  %v694_v49 = vadd.s32 4294967264, %v1378_v40 }
 0x283   :  { %1075 = vpow2.f32 %v799_v52  ;;  %v504_v59 = vadd.f32 %v1360_v6, %v477_v56  ;;  %623 = vperm.xlu1 %1045, %v1060_v53   ;;  %v1062_v60 = vpop.eup %1061  ;;  %v480_v62 = vpop.xlane.xlu0 %479  ;;  %v683_v48 = vsub.s32 %v680_v42, %v1381_v43  ;;  %v676_v51 = vsub.s32 %v673_v44, %v1381_v43 }
 0x284   :  { %1077 = vrcp.f32 %v560_v54  ;;  %v505_v7 = vadd.f32 %v1360_v6, %v480_v62  ;;  %v561_v11 = vadd.f32 1.0, %v1062_v60  ;;  %v687_v52 = vadd.s32 4294967272, %v1378_v40 }
 0x285   :  { %v1064_v63 = vpop.eup %1063  ;;  %v801_v0 = vmul.f32 -1.442695, %v504_v59  ;;  %1079 = vpow2.f32 %v798_v57  ;;  %v697_v57 = vsub.s32 %v694_v49, %v1381_v43  ;;  %v701_v60 = vadd.s32 4294967256, %v1378_v40 }
 0x286   :  { %v1066_v1 = vpop.eup %1065  ;;  %v483_v2 = vpop.xlane.xlu1 %482  ;;  %v562_v5 = vadd.f32 1.0, %v1064_v63  ;;  %v802_v12 = vmul.f32 -1.442695, %v505_v7  ;;  %v690_v59 = vsub.s32 %v687_v52, %v1381_v43  ;;  %v708_v62 = vadd.s32 4294967248, %v1378_v40 }
 0x287   :  { %v1068_v4 = vpop.eup %1067  ;;  %1081 = vpow2.f32 %v801_v0  ;;  %v506_v50 = vadd.f32 %v1360_v6, %v483_v2  ;;  %629 = vperm.xlu1 %1045, %v1066_v1  }
 0x288   :  { %1083 = vrcp.f32 %v559_v61  ;;  %620 = vperm.xlu0 %1046, %v1068_v4   ;;  %v715_v4 = vadd.s32 4294967240, %v1378_v40  ;;  %v711_v7 = vsub.s32 %v708_v62, %v1381_v43 }
 0x289   :  { %v1070_v8 = vpop.eup %1069  ;;  %v803_v9 = vmul.f32 -1.442695, %v506_v50  ;;  %1085 = vpow2.f32 %v800_v3  ;;  %v704_v3 = vsub.s32 %v701_v60, %v1381_v43 }
 0x28a   :  { %v1072_v10 = vpop.eup %1071  ;;  %v564_v55 = vadd.f32 1.0, %v1070_v8  ;;  %1087 = vrcp.f32 %v562_v5  ;;  %v722_v8 = vadd.s32 4294967232, %v1378_v40 }
 0x28b   :  { %626 = vperm.xlu1 %1045, %v1072_v10   ;;  %v1074_v13 = vpop.eup %1073 }
 0x28c   :  { %1089 = vrcp.f32 %v564_v55  ;;  %v563_v17 = vadd.f32 1.0, %v1074_v13  ;;  %v718_v55 = vsub.s32 %v715_v4, %v1381_v43 }
 0x28d   :  { %v1076_v14 = vpop.eup %1075  ;;  %1091 = vpow2.f32 %v803_v9 }
 0x28e   :  { %v1078_v15 = vpop.eup %1077  ;;  %1093 = vrcp.f32 %v561_v11  ;;  %v566_v16 = vadd.f32 1.0, %v1076_v14 }
 0x28f   :  { %1095 = vpow2.f32 %v802_v12  ;;  %635 = vperm.xlu1 %1045, %v1078_v15   ;;  %v1080_v6 = vpop.eup %1079  ;;  %v729_v12 = vadd.s32 4294967224, %v1378_v40  ;;  %v725_v15 = vsub.s32 %v722_v8, %v1381_v43 }
 0x290   :  { %1097 = vrcp.f32 %v566_v16  ;;  %v565_v22 = vadd.f32 1.0, %v1080_v6  ;;  %v736_v16 = vadd.s32 4294967216, %v1378_v40 }
 0x291   :  { %v1082_v18 = vpop.eup %1081  ;;  %1099 = vrcp.f32 %v563_v17 }
 0x292   :  { %v1084_v19 = vpop.eup %1083  ;;  %v568_v20 = vadd.f32 1.0, %v1082_v18 }
 0x293   :  { %632 = vperm.xlu1 %1045, %v1084_v19   ;;  %v1086_v21 = vpop.eup %1085 }
 0x294   :  { %1101 = vrcp.f32 %v568_v20  ;;  %v1088_v23 = vpop.eup %1087  ;;  %v567_v28 = vadd.f32 1.0, %v1086_v21  ;;  %v732_v20 = vsub.s32 %v729_v12, %v1381_v43  ;;  %v743_v21 = vadd.s32 4294967208, %v1378_v40 }
 0x295   :  { %1103 = vrcp.f32 %v565_v22 }
 0x296   :  { %v1090_v24 = vpop.eup %1089 }
 0x297   :  { %v1092_v25 = vpop.eup %1091  ;;  %647 = vperm.xlu0 %1046, %v1090_v24   ;;  %641 = vperm.xlu1 %1045, %v1088_v23   ;;  %v739_v24 = vsub.s32 %v736_v16, %v1381_v43 }
 0x298   :  { %v1094_v26 = vpop.eup %1093  ;;  %v570_v27 = vadd.f32 1.0, %v1092_v25  ;;  %v750_v25 = vadd.s32 4294967200, %v1378_v40 }
 0x299   :  { %v1096_v29 = vpop.eup %1095 }
 0x29a   :  { %v1098_v30 = vpop.eup %1097  ;;  %1105 = vrcp.f32 %v570_v27  ;;  %v569_v31 = vadd.f32 1.0, %v1096_v29  ;;  %v746_v29 = vsub.s32 %v743_v21, %v1381_v43 }
 0x29b   :  { %653 = vperm.xlu0 %1046, %v1098_v30   ;;  %638 = vperm.xlu1 %1045, %v1094_v26   ;;  %1107 = vrcp.f32 %v567_v28  ;;  %v1100_v32 = vpop.eup %1099  ;;  %v757_v30 = vadd.s32 4294967192, %v1378_v40 }
 0x29c   :  { %1109 = vrcp.f32 %v569_v31 }
 0x29e   :  { %v1102_v33 = vpop.eup %1101 }
 0x29f   :  { %659 = vperm.xlu0 %1046, %v1102_v33   ;;  %644 = vperm.xlu1 %1045, %v1100_v32   ;;  %v1104_v34 = vpop.eup %1103 }
 0x2a3   :  { %650 = vperm.xlu1 %1045, %v1104_v34   ;;  %v753_v34 = vsub.s32 %v750_v25, %v1381_v43 }
 0x2a4   :  { %v1106_v35 = vpop.eup %1105 }
 0x2a5   :  { %665 = vperm.xlu0 %1046, %v1106_v35   ;;  %v1108_v36 = vpop.eup %1107  ;;  %v764_v35 = vadd.s32 4294967184, %v1378_v40 }
 0x2a6   :  { %v1110_v37 = vpop.eup %1109 }
 0x2a7   :  { %656 = vperm.xlu1 %1045, %v1108_v36  }
 0x2ab   :  { %662 = vperm.xlu1 %1045, %v1110_v37   ;;  %v771_v37 = vadd.s32 4294967176, %v1378_v40 }
 0x302   :  { %v624_v39 = vpop.permute.xlu1 %623 }
 0x303   :  { %v677_v58 = vrot.slane %v624_v39, %v676_v51 }
 0x306   :  { %v630_v41 = vpop.permute.xlu1 %629 }
 0x307   :  { %v621_v47 = vpop.permute.xlu0 %620  ;;  %v691_v2 = vrot.slane %v630_v41, %v690_v59  ;;  %v760_v41 = vsub.s32 %v757_v30, %v1381_v43 }
 0x308   :  { %v672_v54 = vrot.slane %v621_v47, %v671_v46  ;;  %v774_v46 = vsub.s32 %v771_v37, %v1381_v43 }
 0x30a   :  { %v627_v45 = vpop.permute.xlu1 %626  ;;  %v679_v63 = vsel %vm678_vm1, %v677_v58, %v672_v54 }
 0x30b   :  { %v684_v56 = vrot.slane %v627_v45, %v683_v48  ;;  %v767_v45 = vsub.s32 %v764_v35, %v1381_v43 }
 0x30d   :  { %v686_v0 = vsel %vm685_vm2, %v684_v56, %v679_v63 }
 0x30e   :  { %v636_v53 = vpop.permute.xlu1 %635  ;;  %v693_v9 = vsel %vm692_vm3, %v691_v2, %v686_v0 }
 0x30f   :  { %v705_v11 = vrot.slane %v636_v53, %v704_v3 }
 0x312   :  { %v633_v61 = vpop.permute.xlu1 %632 }
 0x313   :  { %v698_v1 = vrot.slane %v633_v61, %v697_v57 }
 0x315   :  { %v700_v10 = vsel %vm699_vm4, %v698_v1, %v693_v9 }
 0x316   :  { %v642_v5 = vpop.permute.xlu1 %641  ;;  %v648_v50 = vpop.permute.xlu0 %647  ;;  %v707_v17 = vsel %vm706_vm5, %v705_v11, %v700_v10 }
 0x317   :  { %v719_v19 = vrot.slane %v642_v5, %v718_v55  ;;  %v733_v28 = vrot.slane %v648_v50, %v732_v20 }
 0x31a   :  { %v639_v13 = vpop.permute.xlu1 %638  ;;  %v654_v18 = vpop.permute.xlu0 %653 }
 0x31b   :  { %v712_v14 = vrot.slane %v639_v13, %v711_v7  ;;  %v747_v39 = vrot.slane %v654_v18, %v746_v29 }
 0x31d   :  { %v714_v6 = vsel %vm713_vm6, %v712_v14, %v707_v17 }
 0x31e   :  { %v645_v22 = vpop.permute.xlu1 %644  ;;  %v721_v26 = vsel %vm720_vm7, %v719_v19, %v714_v6  ;;  %v660_v32 = vpop.permute.xlu0 %659 }
 0x31f   :  { %v726_v23 = vrot.slane %v645_v22, %v725_v15  ;;  %v761_v51 = vrot.slane %v660_v32, %v760_v41 }
 0x321   :  { %v728_v27 = vsel %vm727_vm8, %v726_v23, %v721_v26 }
 0x322   :  { %v651_v31 = vpop.permute.xlu1 %650  ;;  %v735_v36 = vsel %vm734_vm9, %v733_v28, %v728_v27 }
 0x323   :  { %v740_v33 = vrot.slane %v651_v31, %v739_v24 }
 0x324   :  { %v666_v48 = vpop.permute.xlu0 %665 }
 0x325   :  { %v742_v38 = vsel %vm741_vm10, %v740_v33, %v735_v36  ;;  %v775_v53 = vrot.slane %v666_v48, %v774_v46 }
 0x326   :  { %v657_v42 = vpop.permute.xlu1 %656  ;;  %v749_v47 = vsel %vm748_vm11, %v747_v39, %v742_v38 }
 0x327   :  { %v754_v44 = vrot.slane %v657_v42, %v753_v34 }
 0x329   :  { %v756_v49 = vsel %vm755_vm12, %v754_v44, %v749_v47 }
 0x32a   :  { %v663_v52 = vpop.permute.xlu1 %662  ;;  %v763_v54 = vsel %vm762_vm13, %v761_v51, %v756_v49 }
 0x32b   :  { %v768_v40 = vrot.slane %v663_v52, %v767_v45 }
 0x32d   :  { %v770_v56 = vsel %vm769_vm14, %v768_v40, %v763_v54 }
 0x32e   :  { %v777_v57 = vsel %vm776_vm15, %v775_v53, %v770_v56 }
 0x32f   :  { %779 = vst [vmem:[%s1424_s7] sm:$0x1] %v777_v57 }

</bundles_post_ra>
